<compile_context>
chip_gen: v6e
topology: v6e:2x2x1
jax: 0.10.0
libtpu: 0.0.40
codegen_flags: <defaults>
</compile_context>

<pallas_src>
import math

import jax
import jax.numpy as jnp
from jax import lax
from jax.experimental import pallas as pl
from jax.experimental.pallas import tpu as pltpu


# ----------------------------------------------------------------------------
# Prologue: row-wise L2 normalization -> bf16   (each row normalized exactly once)
# ----------------------------------------------------------------------------
def _normalize_rows_kernel(x_ref, o_ref):
    x = x_ref[...].astype(jnp.float32)                    # (tr, D)
    sumsq = jnp.sum(x * x, axis=1, keepdims=True)         # (tr, 1)
    # F.normalize: x / max(||x||, 1e-12)  ==  x * rsqrt(max(sumsq, 1e-24))
    inv = lax.rsqrt(jnp.maximum(sumsq, 1e-24))
    o_ref[...] = (x * inv).astype(o_ref.dtype)


def _pick_tile(dim, candidates):
    for t in candidates:
        if dim % t == 0:
            return t
    return dim  # fall back to the full (unblocked) dimension


def _normalize_rows_bf16(x):
    n, d = x.shape
    tr = _pick_tile(n, (512, 256, 128, 64, 32, 16, 8))
    return pl.pallas_call(
        _normalize_rows_kernel,
        out_shape=jax.ShapeDtypeStruct((n, d), jnp.bfloat16),
        grid=(n // tr,),
        in_specs=[pl.BlockSpec((tr, d), lambda i: (i, 0))],
        out_specs=pl.BlockSpec((tr, d), lambda i: (i, 0)),
        compiler_params=pltpu.CompilerParams(dimension_semantics=("parallel",)),
    )(x)


# ----------------------------------------------------------------------------
# Main kernel: cosine matmul + ArcFace margin epilogue, tiled over (B, C)
# ----------------------------------------------------------------------------
def _make_arc_margin_kernel(s, cos_m, sin_m, th, mm, easy_margin, ls_eps,
                            out_features, tn):
    def kernel(label_ref, xn_ref, wn_ref, out_ref):
        # xn_ref: (tm, D) bf16, wn_ref: (tn, D) bf16, label_ref: (tm, 1) int32
        # Contract last dims directly: no transposed copy of the weight tile.
        cosine = lax.dot_general(
            xn_ref[...], wn_ref[...],
            dimension_numbers=(((1,), (1,)), ((), ())),
            preferred_element_type=jnp.float32)            # (tm, tn) f32

        # Clamp before sqrt: bf16 rounding can push |cos| slightly above 1.
        sine = jnp.sqrt(jnp.clip(1.0 - cosine * cosine, 0.0, 1.0))
        phi = cosine * cos_m - sine * sin_m
        if easy_margin:
            phi = jnp.where(cosine > 0.0, phi, cosine)
        else:
            phi = jnp.where(cosine > th, phi, cosine - mm)

        # One-hot select with tile-offset column indices (correct under C tiling).
        j = pl.program_id(1)
        tm_b, tn_b = out_ref.shape
        col_ids = jax.lax.broadcasted_iota(jnp.int32, (tm_b, tn_b), 1) + j * tn
        is_target = col_ids == label_ref[...]              # (tm,1) -> (tm,tn)

        if ls_eps > 0.0:
            # out = s*cos + alpha*(phi - cos), alpha = s * smoothed one-hot
            on = s * ((1.0 - ls_eps) + ls_eps / out_features)
            off = s * (ls_eps / out_features)
            alpha = jnp.where(is_target, on, off)
            out_ref[...] = s * cosine + alpha * (phi - cosine)
        else:
            # Exact (bitwise) match to one_hot*phi + (1-one_hot)*cos, one select + one mul.
            out_ref[...] = s * jnp.where(is_target, phi, cosine)

    return kernel


def arc_margin_product(x, weight, label, *, s=30.0, m=0.5,
                       easy_margin=False, ls_eps=0.0):
    """x: (B, in_features) f32, weight: (out_features, in_features) f32,
    label: (B,) int. Returns (B, out_features) f32."""
    B, D = x.shape
    C, D2 = weight.shape
    assert D == D2

    cos_m = math.cos(m)
    sin_m = math.sin(m)
    th = math.cos(math.pi - m)
    mm = math.sin(math.pi - m) * m

    # Normalize once (prologue kernels), emit bf16 for the MXU pass.
    xn = _normalize_rows_bf16(x)          # (B, D) bf16
    wn = _normalize_rows_bf16(weight)     # (C, D) bf16

    # Conservative generation-safe tiles: with D<=1024 the double-buffered
    # footprint 2*(tm*D*2 + tn*D*2 + tm*tn*4) stays well under v7x's 32 MiB
    # scoped-VMEM default; v5e/v6e have more headroom and could go larger.
    tm = _pick_tile(B, (256, 128, 64, 32, 16, 8))
    tn = _pick_tile(C, (512, 256, 128))   # keep output lane-dense (mult of 128)

    kernel = _make_arc_margin_kernel(s, cos_m, sin_m, th, mm,
                                     easy_margin, ls_eps, C, tn)

    label_2d = label.reshape(B, 1).astype(jnp.int32)

    return pl.pallas_call(
        kernel,
        out_shape=jax.ShapeDtypeStruct((B, C), jnp.float32),
        grid_spec=pltpu.PrefetchScalarGridSpec(
            num_scalar_prefetch=0,
            grid=(B // tm, C // tn),
            in_specs=[
                pl.BlockSpec((tm, 1), lambda i, j: (i, 0)),   # labels (VMEM int32)
                pl.BlockSpec((tm, D), lambda i, j: (i, 0)),   # normalized input
                pl.BlockSpec((tn, D), lambda i, j: (j, 0)),   # normalized weight
            ],
            out_specs=pl.BlockSpec((tm, tn), lambda i, j: (i, j)),
        ),
        compiler_params=pltpu.CompilerParams(
            dimension_semantics=("parallel", "parallel")),
    )(label_2d, xn, wn)


# ----------------------------------------------------------------------------
# Demo + correctness check
# ----------------------------------------------------------------------------
if __name__ == "__main__":
    B, IN_F, OUT_F = 8, 32, 128
    S, M = 30.0, 0.5

    key = jax.random.PRNGKey(0)
    kx, kw, kl = jax.random.split(key, 3)

    # xavier_uniform_ init for weight (out_features, in_features)
    bound = math.sqrt(6.0 / (IN_F + OUT_F))
    weight = jax.random.uniform(kw, (OUT_F, IN_F), jnp.float32,
                                minval=-bound, maxval=bound)
    x = jax.random.normal(kx, (B, IN_F), jnp.float32)
    label = jax.random.randint(kl, (B,), 0, OUT_F, jnp.int32)

    out = arc_margin_product(x, weight, label, s=S, m=M,
                             easy_margin=False, ls_eps=0.0)
    jax.block_until_ready(out)
    assert out.shape == (B, OUT_F)

    cos_m, sin_m = math.cos(M), math.sin(M)
    th = math.cos(math.pi - M)
    mm = math.sin(math.pi - M) * M

    def _norm_rows(a, dtype):
        inv = lax.rsqrt(jnp.maximum(jnp.sum(a * a, axis=1, keepdims=True), 1e-24))
        return (a * inv).astype(dtype)

    def ref(xx, ww, lb, mat_dtype):
        xn = _norm_rows(xx, mat_dtype)
        wn = _norm_rows(ww, mat_dtype)
        cosine = lax.dot_general(xn, wn, (((1,), (1,)), ((), ())),
                                 preferred_element_type=jnp.float32)
        sine = jnp.sqrt(jnp.clip(1.0 - cosine * cosine, 0.0, 1.0))
        phi = cosine * cos_m - sine * sin_m
        phi = jnp.where(cosine > th, phi, cosine - mm)
        one_hot = jax.nn.one_hot(lb, OUT_F, dtype=jnp.float32)
        return (one_hot * phi + (1.0 - one_hot) * cosine) * S

    # Tight check vs a reference that mirrors the kernel's bf16 matmul precision.
    expected_bf16 = ref(x, weight, label, jnp.bfloat16)
    assert jnp.allclose(out, expected_bf16, atol=5e-3, rtol=1e-3)

    # Loose sanity bound vs the full-f32 PyTorch-equivalent reference.
    expected_f32 = ref(x, weight, label, jnp.float32)
    assert jnp.max(jnp.abs(out - expected_f32)) < 0.5

    print("KERNEL_OK")
</pallas_src>

<mosaic_0001>
module attributes {stable_mosaic.version = 11 : i64} {
  func.func @_normalize_rows_kernel(%arg0: i32, %arg1: memref<8x32xf32, #tpu.memory_space<vmem>>, %arg2: memref<8x32xbf16, #tpu.memory_space<vmem>>) attributes {dimension_semantics = [#tpu.dimension_semantics<parallel>], iteration_bounds = array<i64: 1>, scalar_prefetch = 0 : i64, scratch_operands = 0 : i64, tpu.core_type = #tpu.core_type<tc>, window_params = [{transform_indices = @transform_0, window_bounds = array<i64: 8, 32>}, {transform_indices = @transform_1, window_bounds = array<i64: 8, 32>}]} {
    %c0 = arith.constant 0 : index
    %c0_0 = arith.constant 0 : index
    %0 = vector.load %arg1[%c0, %c0_0] : memref<8x32xf32, #tpu.memory_space<vmem>>, vector<8x32xf32>
    %1 = arith.mulf %0, %0 : vector<8x32xf32>
    %cst = arith.constant dense<0.000000e+00> : vector<8xf32>
    %2 = vector.multi_reduction <add>, %1, %cst [1] : vector<8x32xf32> to vector<8xf32>
    %3 = vector.shape_cast %2 : vector<8xf32> to vector<8x1xf32>
    %cst_1 = arith.constant 1.000000e-24 : f32
    %4 = vector.broadcast %cst_1 : f32 to vector<8x1xf32>
    %5 = arith.maximumf %3, %4 : vector<8x1xf32>
    %6 = math.rsqrt %5 : vector<8x1xf32>
    %7 = vector.broadcast %6 : vector<8x1xf32> to vector<8x32xf32>
    %8 = arith.mulf %0, %7 : vector<8x32xf32>
    %9 = arith.truncf %8 : vector<8x32xf32> to vector<8x32xbf16>
    %c0_2 = arith.constant 0 : index
    %c0_3 = arith.constant 0 : index
    %10 = vector.load %arg2[%c0_2, %c0_3] : memref<8x32xbf16, #tpu.memory_space<vmem>>, vector<8x32xbf16>
    tpu.vector_store %arg2[%c0_2, %c0_3], %9 {strides = array<i32>} : memref<8x32xbf16, #tpu.memory_space<vmem>>, vector<8x32xbf16>,
    return
  }
  func.func @transform_0(%arg0: i32) -> (i32, i32) {
    %c0_i32 = arith.constant 0 : i32
    %c0_i32_0 = arith.constant 0 : i32
    return %arg0, %c0_i32 : i32, i32
  }
  func.func @transform_1(%arg0: i32) -> (i32, i32) {
    %c0_i32 = arith.constant 0 : i32
    %c0_i32_0 = arith.constant 0 : i32
    return %arg0, %c0_i32 : i32, i32
  }
}

</mosaic_0001>

<bundles_post_ra>
// kernel: tpu_custom_call.1
= control target key start
LH: loop header
LB: loop body
LE: loop exit
PB: predicated region body
PF: predicated region fallthrough
CT: control target
= control target key end

     0   :  { %6 = vsyncpa [#allocation3], 0  ;;  %s114_s0 = inlined_call_operand.hbm [shape: f32[8,32], index: 0, kind: input, shape index: {}]   ;;  %s115_s1 = inlined_call_operand.hbm [shape: bf16[8,32], index: 1, kind: output, shape index: {}]  }
   0x1   :  { %7 = vsyncpa [#allocation4], 0  ;;  %s96_s6 = smov [#allocation2]  }
   0x2   :  { %s14_s7 = sshll.u32 %s96_s6, 4  ;;  %s15_s7 = int_to_ptr.vmem [resolvable:$true] %s14_s7 }
   0x3   :  { %s60_s8 = scalar_lea.vmem %s15_s7, 128  ;;  %p65_p1 = scmp.lt.s32.totalorder %s15_s7, %s15_s7 }
   0x4   :  { %p61_p0 = scmp.ne.s32.totalorder %s15_s7, %s60_s8  ;;  %p66_p2 = scmp.lt.s32.totalorder %s60_s8, %s60_s8 }
   0x6   :  { %p67_p3 = por %p66_p2, %p65_p1 }
   0x8   :  { %p68_p4 = pnand %p67_p3, %p61_p0 }
   0xa   :  { %71 = shalt.err (!%p68_p4)
}
   0xb   :  { %17 = dma.hbm_to_vmem [thread:$0]  %s114_s0, 128, %s15_s7, [#allocation3]  }
   0xc   :  { %92 = dma.done.wait [#allocation3], 128  }
   0xd   :  { %93 = vsyncadd [#allocation3], 4294967168  ;;  %v21_v0 = vld [vmem:[#allocation2] sm:$0xff]  ;;  %vm23_vm0 = vcmask 261120   ;;  %s97_s11 = smov [#allocation5]   ;;  %vm31_vm1 = vcmask 257024  }
   0xe   :  { %v22_v1 = vmul.f32 %v21_v0, %v21_v0  ;;  %s39_s12 = sshll.u32 %s97_s11, 4  ;;  %s40_s12 = int_to_ptr.vmem [resolvable:$true] %s39_s12 }
   0xf   :  { %s72_s13 = scalar_lea.vmem %s40_s12, 64  ;;  %p77_p6 = scmp.lt.s32.totalorder %s40_s12, %s40_s12 }
  0x10   :  { %v24_v2 = vsel %vm23_vm0, %v22_v1, 0.0  ;;  %p73_p5 = scmp.ne.s32.totalorder %s40_s12, %s72_s13  ;;  %p78_p7 = scmp.lt.s32.totalorder %s72_s13, %s72_s13 }
  0x11   :  { %25 = vadd.xlane.f32.xlu0 %v24_v2 }
  0x12   :  { %p79_p8 = por %p78_p7, %p77_p6 }
  0x14   :  { %p80_p9 = pnand %p79_p8, %p73_p5 }
  0x9a   :  { %v26_v3 = vpop.xlane.xlu0 %25 }
  0x9b   :  { %v27_v4 = vmax.f32 %v26_v3, 1e-24 }
  0x9d   :  { %50 = vrsqrt.f32 %v27_v4 }
  0xaa   :  { %v51_v5 = vpop.eup %50 }
  0xab   :  { %v29_v6 = vmul.f32 %v51_v5, %v21_v0 }
  0xad   :  { %v30_v7 = vpack.c.bf16 %v29_v6, %v29_v6 }
  0xaf   :  { %32 = vst.msk [vmem:[#allocation5] sm:$0xf] %vm31_vm1, %v30_v7 }
  0xb0   :  { %83 = shalt.err (!%p80_p9)
}
  0xb1   :  { %42 = dma.vmem_to_hbm [thread:$0]  %s40_s12, 64, %s115_s1, [#allocation4]  }
  0xb2   :  { %94 = dma.done.wait [#allocation4], 64  }
  0xb3   :  { %95 = vsyncadd [#allocation4], 4294967232 }
  0xb4   :  { %46 = vsyncpa [#allocation3], 1 }
  0xb5   :  { %47 = vsyncpa [#allocation4], 1 }

</bundles_post_ra>
